<compile_context>
chip_gen: v7x
topology: tpu7x:2x2x1
jax: 0.10.0
libtpu: 0.0.40
codegen_flags: <defaults>
</compile_context>

<pallas_src>
import jax
import jax.numpy as jnp
from jax import lax
from jax.experimental import pallas as pl
from jax.experimental.pallas import tpu as pltpu

EPS_JS = 1e-10        # EPISILON in calculate_js_divergence2
NORM_EPS = 1e-12      # F.normalize default eps
LOG_CLAMP = -100.0    # torch binary_cross_entropy clamps log() at -100
MARGIN = 1.0
TEMPERATURE = 0.5     # defined in __init__, unused in forward (kept for parity)


def _metric_cont_spea_kernel(lipA_ref, lipV_ref, outsA_ref, outsV_ref,
                             label_ref, bce_row_ref, metric_row_ref):
    # ---- JS divergence on the lip features, in their native (T, tb, Dlip)
    #      layout (no HBM-side transpose). ----
    p = lipA_ref[...].astype(jnp.float32)                      # (T, tb, Dlip)
    q = lipV_ref[...].astype(jnp.float32)                      # (T, tb, Dlip)
    dlip = p.shape[-1]

    r = p * pl.reciprocal(q, approx=True)                      # ~ p / q  (EUP)
    r_inv = pl.reciprocal(r, approx=True)                      # ~ q / p  (EUP)
    loss1 = jnp.sum(p * jnp.log(r + EPS_JS), axis=2) / dlip    # (T, tb)
    loss2 = jnp.sum(q * jnp.log(r_inv + EPS_JS), axis=2) / dlip
    lip_js = jnp.transpose((loss1 + loss2) * 0.5)              # (tb, T) small 2-D xpose

    # ---- Folded F.normalize + cosine_similarity on (tb, T, D) features ----
    a = outsA_ref[...].astype(jnp.float32)                     # (tb, T, D)
    v = outsV_ref[...].astype(jnp.float32)                     # (tb, T, D)
    sa = jnp.sum(a * a, axis=2)                                # (tb, T)
    sv = jnp.sum(v * v, axis=2)                                # (tb, T)
    dav = jnp.sum(a * v, axis=2)                               # (tb, T)
    cos = (dav
           * lax.rsqrt(jnp.maximum(sa, NORM_EPS * NORM_EPS))
           * lax.rsqrt(jnp.maximum(sv, NORM_EPS * NORM_EPS)))
    # Guard fp overshoot: |cos| may exceed 1 by a few ulps, which would make
    # log(1 - cos_scaled) NaN (torch's BCE rejects inputs outside [0, 1]).
    cos = jnp.clip(cos, -1.0, 1.0)
    cos_scaled = (cos + 1.0) * 0.5                             # (tb, T)

    # ---- binary_cross_entropy(cos_scaled, 1 - lip_js): per-row partial sums ----
    target = 1.0 - lip_js                                      # (tb, T)
    log_p = jnp.maximum(jnp.log(cos_scaled), LOG_CLAMP)
    log_1mp = jnp.maximum(jnp.log(1.0 - cos_scaled), LOG_CLAMP)
    bce = -(target * log_p + (1.0 - target) * log_1mp)         # (tb, T)
    bce_row_ref[...] = jnp.sum(bce, axis=1, keepdims=True)     # (tb, 1)

    # ---- contrastive metric per batch row (T fully resident per block) ----
    labels = label_ref[...].astype(jnp.float32)                # (tb, 1)
    diff = target - cos_scaled                                 # pre - cos_scaled
    dist2 = jnp.sum(diff * diff, axis=1, keepdims=True)        # (tb, 1)
    dist = jax.nn.sigmoid(jnp.sqrt(dist2))
    loss_close = (1.0 - labels) * dist * dist
    loss_far = labels * jnp.square(jnp.maximum(MARGIN - dist, 0.0))
    metric_row_ref[...] = loss_close + loss_far                # (tb, 1)


def _choose_block_b(B, T, Dlip, D, lip_isz, outs_isz):
    """Largest multiple-of-8 divisor of B whose input tiles stay under ~4 MiB
    (x2 for double-buffering => ~8 MiB of VMEM, safe on v5e/v6e/v7x)."""
    row_bytes = 2 * T * Dlip * lip_isz + 2 * T * D * outs_isz
    cap = max(8, (4 * 1024 * 1024) // max(row_bytes, 1))
    best = None
    b = 8
    while b <= min(B, cap):
        if B % b == 0:
            best = b
        b += 8
    if best is None:
        # Tiny / non-multiple-of-8 batch: single full-B block keeps the
        # BlockSpec second-minor dim equal to the array dim (layout rule).
        return B
    return best


def metric_cont_spea(LipOutsA, OutsA, LipOutsV, OutsV, Label, *, block_b=None):
    """Forward of MetricCont_Spea.

    LipOuts*: (T, B, Dlip) (time-major, as given to the module)
    Outs*:    (B, T, D)
    Label:    (B, L)  -- only Label[:, 0] is used
    Returns (loss, metric) f32 scalars.
    """
    T, B, Dlip = LipOutsA.shape
    Bo, To, D = OutsA.shape
    assert (Bo, To) == (B, T), "Lip and Outs batch/time dims must agree"

    label_col = Label[:, :1].astype(jnp.float32)               # (B, 1)

    lip_isz = jnp.dtype(LipOutsA.dtype).itemsize
    outs_isz = jnp.dtype(OutsA.dtype).itemsize
    if block_b is None:
        block_b = _choose_block_b(B, T, Dlip, D, lip_isz, outs_isz)
    assert B % block_b == 0 and (block_b % 8 == 0 or block_b == B), \
        f"block_b={block_b} incompatible with B={B}"
    n_blocks = B // block_b

    # VMEM budget: double-buffered input tiles + tiny per-block outputs + slack
    # for in-kernel f32 temporaries / spill.
    tile_bytes = (block_b * (2 * T * Dlip * lip_isz + 2 * T * D * outs_isz + 4)
                  + 2 * block_b * 4)
    vmem_limit = int(min(max(2 * tile_bytes + (4 << 20), 16 << 20), 64 << 20))
    # TODO(synk): for very large T*D (a single 8-row tile beyond the budget)
    # the T axis would additionally be tiled with an "arbitrary" accumulator
    # grid dim; not needed for the shapes this module is used with.

    cost = pl.CostEstimate(
        flops=int(B * T * (8 * Dlip + 6 * D + 32)),
        transcendentals=int(B * T * (2 * Dlip + 8)),
        bytes_accessed=int(2 * B * T * Dlip * lip_isz
                           + 2 * B * T * D * outs_isz + B * 4 + 2 * B * 4),
    )

    grid_spec = pltpu.PrefetchScalarGridSpec(
        num_scalar_prefetch=0,
        grid=(n_blocks,),
        in_specs=[
            pl.BlockSpec((T, block_b, Dlip), lambda i: (0, i, 0)),   # LipOutsA
            pl.BlockSpec((T, block_b, Dlip), lambda i: (0, i, 0)),   # LipOutsV
            pl.BlockSpec((block_b, T, D), lambda i: (i, 0, 0)),      # OutsA
            pl.BlockSpec((block_b, T, D), lambda i: (i, 0, 0)),      # OutsV
            pl.BlockSpec((block_b, 1), lambda i: (i, 0)),            # Label[:, :1]
        ],
        out_specs=[
            pl.BlockSpec((block_b, 1), lambda i: (i, 0)),            # bce row sums
            pl.BlockSpec((block_b, 1), lambda i: (i, 0)),            # metric rows
        ],
    )

    bce_rows, metric_rows = pl.pallas_call(
        _metric_cont_spea_kernel,
        out_shape=(jax.ShapeDtypeStruct((B, 1), jnp.float32),
                   jax.ShapeDtypeStruct((B, 1), jnp.float32)),
        grid_spec=grid_spec,
        compiler_params=pltpu.CompilerParams(
            dimension_semantics=("parallel",),
            vmem_limit_bytes=vmem_limit),
        cost_estimate=cost,
    )(LipOutsA, LipOutsV, OutsA, OutsV, label_col)

    # Tiny cross-block reductions kept out of the kernel so the B grid axis
    # stays "parallel" across TensorCores (no shared scalar accumulator).
    loss = jnp.sum(bce_rows) / (B * T)
    metric = jnp.sum(metric_rows) / B
    return loss, metric


def _metric_cont_spea_ref(LipOutsA, OutsA, LipOutsV, OutsV, Label):
    """Pure-JAX reference matching the PyTorch forward (for tolerance check)."""
    lipA = jnp.transpose(LipOutsA, (1, 0, 2)).astype(jnp.float32)
    lipV = jnp.transpose(LipOutsV, (1, 0, 2)).astype(jnp.float32)
    loss1 = jnp.mean(lipA * jnp.log(lipA / lipV + EPS_JS), axis=2)
    loss2 = jnp.mean(lipV * jnp.log(lipV / lipA + EPS_JS), axis=2)
    lip_js = (loss1 + loss2) * 0.5
    a = OutsA.astype(jnp.float32)
    v = OutsV.astype(jnp.float32)
    a_n = a / jnp.maximum(jnp.linalg.norm(a, axis=2, keepdims=True), NORM_EPS)
    v_n = v / jnp.maximum(jnp.linalg.norm(v, axis=2, keepdims=True), NORM_EPS)
    denom = jnp.maximum(jnp.linalg.norm(a_n, axis=2)
                        * jnp.linalg.norm(v_n, axis=2), 1e-8)
    cos = jnp.sum(a_n * v_n, axis=2) / denom
    cos_scaled = (cos + 1.0) * 0.5
    target = 1.0 - lip_js
    bce = -(target * jnp.maximum(jnp.log(cos_scaled), LOG_CLAMP)
            + (1.0 - target) * jnp.maximum(jnp.log(1.0 - cos_scaled), LOG_CLAMP))
    loss = jnp.mean(bce)
    labels = Label[:, 0].astype(jnp.float32)
    dist = jax.nn.sigmoid(jnp.sqrt(jnp.sum((target - cos_scaled) ** 2, axis=1)))
    metric = jnp.mean((1.0 - labels) * dist ** 2
                      + labels * jnp.maximum(MARGIN - dist, 0.0) ** 2)
    return loss, metric


if __name__ == "__main__":
    key = jax.random.PRNGKey(0)
    k1, k2, k3, k4, k5 = jax.random.split(key, 5)

    # Shapes consistent with the forward pass:
    #   LipOuts*: (T, B, Dlip) -- time-major, as given to the module
    #   Outs*:    (B, T, D)
    #   Label:    (B, L); only Label[:, 0] is used
    B, T, Dlip, D = 16, 8, 16, 32

    # Lip features as probability-like tensors (positive) so log(p/q) is defined.
    LipOutsA = jax.nn.softmax(jax.random.normal(k1, (T, B, Dlip)), axis=-1)
    LipOutsV = jax.nn.softmax(jax.random.normal(k2, (T, B, Dlip)), axis=-1)
    OutsA = jax.random.normal(k3, (B, T, D), dtype=jnp.float32)
    OutsV = jax.random.normal(k4, (B, T, D), dtype=jnp.float32)
    Label = (jax.random.uniform(k5, (B, 4)) > 0.5).astype(jnp.float32)

    # block_b=8 -> 2-step grid, exercising the tiled / multi-block path.
    loss, metric = metric_cont_spea(LipOutsA, OutsA, LipOutsV, OutsV, Label,
                                    block_b=8)
    jax.block_until_ready((loss, metric))

    loss_ref, metric_ref = _metric_cont_spea_ref(LipOutsA, OutsA, LipOutsV,
                                                 OutsV, Label)
    ok = (bool(jnp.isfinite(loss)) and bool(jnp.isfinite(metric))
          and bool(jnp.allclose(loss, loss_ref, rtol=5e-2, atol=1e-2))
          and bool(jnp.allclose(metric, metric_ref, rtol=5e-2, atol=1e-2)))
    if not ok:
        raise SystemExit(
            f"mismatch: loss={float(loss)} vs ref {float(loss_ref)}, "
            f"metric={float(metric)} vs ref {float(metric_ref)}")
    print("KERNEL_OK")
</pallas_src>

<mosaic_0001>
module attributes {stable_mosaic.version = 11 : i64} {
  func.func @_metric_cont_spea_kernel(%arg0: i32, %arg1: memref<8x8x16xf32, #tpu.memory_space<vmem>>, %arg2: memref<8x8x16xf32, #tpu.memory_space<vmem>>, %arg3: memref<8x8x32xf32, #tpu.memory_space<vmem>>, %arg4: memref<8x8x32xf32, #tpu.memory_space<vmem>>, %arg5: memref<8x1xf32, #tpu.memory_space<vmem>>, %arg6: memref<8x1xf32, #tpu.memory_space<vmem>>, %arg7: memref<8x1xf32, #tpu.memory_space<vmem>>) attributes {dimension_semantics = [#tpu.dimension_semantics<parallel>], iteration_bounds = array<i64: 2>, scalar_prefetch = 0 : i64, scratch_operands = 0 : i64, tpu.core_type = #tpu.core_type<tc>, window_params = [{transform_indices = @transform_0, window_bounds = array<i64: 8, 8, 16>}, {transform_indices = @transform_1, window_bounds = array<i64: 8, 8, 16>}, {transform_indices = @transform_2, window_bounds = array<i64: 8, 8, 32>}, {transform_indices = @transform_3, window_bounds = array<i64: 8, 8, 32>}, {transform_indices = @transform_4, window_bounds = array<i64: 8, 1>}, {transform_indices = @transform_5, window_bounds = array<i64: 8, 1>}, {transform_indices = @transform_6, window_bounds = array<i64: 8, 1>}]} {
    %c0 = arith.constant 0 : index
    %c0_0 = arith.constant 0 : index
    %c0_1 = arith.constant 0 : index
    %0 = vector.load %arg1[%c0, %c0_0, %c0_1] : memref<8x8x16xf32, #tpu.memory_space<vmem>>, vector<8x8x16xf32>
    %c0_2 = arith.constant 0 : index
    %c0_3 = arith.constant 0 : index
    %c0_4 = arith.constant 0 : index
    %1 = vector.load %arg2[%c0_2, %c0_3, %c0_4] : memref<8x8x16xf32, #tpu.memory_space<vmem>>, vector<8x8x16xf32>
    %2 = tpu.reciprocal %1 {approx = true} : vector<8x8x16xf32> -> vector<8x8x16xf32>
    %3 = arith.mulf %0, %2 : vector<8x8x16xf32>
    %4 = tpu.reciprocal %3 {approx = true} : vector<8x8x16xf32> -> vector<8x8x16xf32>
    %cst = arith.constant 1.000000e-10 : f32
    %5 = vector.broadcast %cst : f32 to vector<8x8x16xf32>
    %6 = arith.addf %3, %5 : vector<8x8x16xf32>
    %7 = math.log %6 : vector<8x8x16xf32>
    %8 = arith.mulf %0, %7 : vector<8x8x16xf32>
    %cst_5 = arith.constant dense<0.000000e+00> : vector<8x8xf32>
    %9 = vector.multi_reduction <add>, %8, %cst_5 [2] : vector<8x8x16xf32> to vector<8x8xf32>
    %cst_6 = arith.constant 1.600000e+01 : f32
    %10 = vector.broadcast %cst_6 : f32 to vector<8x8xf32>
    %11 = arith.divf %9, %10 : vector<8x8xf32>
    %cst_7 = arith.constant 1.000000e-10 : f32
    %12 = vector.broadcast %cst_7 : f32 to vector<8x8x16xf32>
    %13 = arith.addf %4, %12 : vector<8x8x16xf32>
    %14 = math.log %13 : vector<8x8x16xf32>
    %15 = arith.mulf %1, %14 : vector<8x8x16xf32>
    %cst_8 = arith.constant dense<0.000000e+00> : vector<8x8xf32>
    %16 = vector.multi_reduction <add>, %15, %cst_8 [2] : vector<8x8x16xf32> to vector<8x8xf32>
    %cst_9 = arith.constant 1.600000e+01 : f32
    %17 = vector.broadcast %cst_9 : f32 to vector<8x8xf32>
    %18 = arith.divf %16, %17 : vector<8x8xf32>
    %19 = arith.addf %11, %18 : vector<8x8xf32>
    %cst_10 = arith.constant 5.000000e-01 : f32
    %20 = vector.broadcast %cst_10 : f32 to vector<8x8xf32>
    %21 = arith.mulf %19, %20 : vector<8x8xf32>
    %22 = tpu.transpose %21, [1, 0] : vector<8x8xf32> -> vector<8x8xf32>
    %c0_11 = arith.constant 0 : index
    %c0_12 = arith.constant 0 : index
    %c0_13 = arith.constant 0 : index
    %23 = vector.load %arg3[%c0_11, %c0_12, %c0_13] : memref<8x8x32xf32, #tpu.memory_space<vmem>>, vector<8x8x32xf32>
    %c0_14 = arith.constant 0 : index
    %c0_15 = arith.constant 0 : index
    %c0_16 = arith.constant 0 : index
    %24 = vector.load %arg4[%c0_14, %c0_15, %c0_16] : memref<8x8x32xf32, #tpu.memory_space<vmem>>, vector<8x8x32xf32>
    %25 = arith.mulf %23, %23 : vector<8x8x32xf32>
    %cst_17 = arith.constant dense<0.000000e+00> : vector<8x8xf32>
    %26 = vector.multi_reduction <add>, %25, %cst_17 [2] : vector<8x8x32xf32> to vector<8x8xf32>
    %27 = arith.mulf %24, %24 : vector<8x8x32xf32>
    %cst_18 = arith.constant dense<0.000000e+00> : vector<8x8xf32>
    %28 = vector.multi_reduction <add>, %27, %cst_18 [2] : vector<8x8x32xf32> to vector<8x8xf32>
    %29 = arith.mulf %23, %24 : vector<8x8x32xf32>
    %cst_19 = arith.constant dense<0.000000e+00> : vector<8x8xf32>
    %30 = vector.multi_reduction <add>, %29, %cst_19 [2] : vector<8x8x32xf32> to vector<8x8xf32>
    %cst_20 = arith.constant 1.000000e-24 : f32
    %31 = vector.broadcast %cst_20 : f32 to vector<8x8xf32>
    %32 = arith.maximumf %26, %31 : vector<8x8xf32>
    %33 = math.rsqrt %32 : vector<8x8xf32>
    %34 = arith.mulf %30, %33 : vector<8x8xf32>
    %cst_21 = arith.constant 1.000000e-24 : f32
    %35 = vector.broadcast %cst_21 : f32 to vector<8x8xf32>
    %36 = arith.maximumf %28, %35 : vector<8x8xf32>
    %37 = math.rsqrt %36 : vector<8x8xf32>
    %38 = arith.mulf %34, %37 : vector<8x8xf32>
    %cst_22 = arith.constant -1.000000e+00 : f32
    %cst_23 = arith.constant 1.000000e+00 : f32
    %39 = vector.broadcast %cst_22 : f32 to vector<8x8xf32>
    %40 = arith.maximumf %39, %38 : vector<8x8xf32>
    %41 = vector.broadcast %cst_23 : f32 to vector<8x8xf32>
    %42 = arith.minimumf %41, %40 : vector<8x8xf32>
    %cst_24 = arith.constant 1.000000e+00 : f32
    %43 = vector.broadcast %cst_24 : f32 to vector<8x8xf32>
    %44 = arith.addf %42, %43 : vector<8x8xf32>
    %cst_25 = arith.constant 5.000000e-01 : f32
    %45 = vector.broadcast %cst_25 : f32 to vector<8x8xf32>
    %46 = arith.mulf %44, %45 : vector<8x8xf32>
    %cst_26 = arith.constant 1.000000e+00 : f32
    %47 = vector.broadcast %cst_26 : f32 to vector<8x8xf32>
    %48 = arith.subf %47, %22 : vector<8x8xf32>
    %49 = math.log %46 : vector<8x8xf32>
    %cst_27 = arith.constant -1.000000e+02 : f32
    %50 = vector.broadcast %cst_27 : f32 to vector<8x8xf32>
    %51 = arith.maximumf %49, %50 : vector<8x8xf32>
    %cst_28 = arith.constant 1.000000e+00 : f32
    %52 = vector.broadcast %cst_28 : f32 to vector<8x8xf32>
    %53 = arith.subf %52, %46 : vector<8x8xf32>
    %54 = math.log %53 : vector<8x8xf32>
    %cst_29 = arith.constant -1.000000e+02 : f32
    %55 = vector.broadcast %cst_29 : f32 to vector<8x8xf32>
    %56 = arith.maximumf %54, %55 : vector<8x8xf32>
    %57 = arith.mulf %48, %51 : vector<8x8xf32>
    %cst_30 = arith.constant 1.000000e+00 : f32
    %58 = vector.broadcast %cst_30 : f32 to vector<8x8xf32>
    %59 = arith.subf %58, %48 : vector<8x8xf32>
    %60 = arith.mulf %59, %56 : vector<8x8xf32>
    %61 = arith.addf %57, %60 : vector<8x8xf32>
    %cst_31 = arith.constant 0.000000e+00 : f32
    %62 = vector.broadcast %cst_31 : f32 to vector<8x8xf32>
    %63 = arith.subf %62, %61 : vector<8x8xf32>
    %cst_32 = arith.constant dense<0.000000e+00> : vector<8xf32>
    %64 = vector.multi_reduction <add>, %63, %cst_32 [1] : vector<8x8xf32> to vector<8xf32>
    %65 = vector.shape_cast %64 : vector<8xf32> to vector<8x1xf32>
    %c0_33 = arith.constant 0 : index
    %c0_34 = arith.constant 0 : index
    %66 = vector.load %arg6[%c0_33, %c0_34] : memref<8x1xf32, #tpu.memory_space<vmem>>, vector<8x1xf32>
    tpu.vector_store %arg6[%c0_33, %c0_34], %65 {strides = array<i32>} : memref<8x1xf32, #tpu.memory_space<vmem>>, vector<8x1xf32>,
    %c0_35 = arith.constant 0 : index
    %c0_36 = arith.constant 0 : index
    %67 = vector.load %arg5[%c0_35, %c0_36] : memref<8x1xf32, #tpu.memory_space<vmem>>, vector<8x1xf32>
    %68 = arith.subf %48, %46 : vector<8x8xf32>
    %69 = arith.mulf %68, %68 : vector<8x8xf32>
    %cst_37 = arith.constant dense<0.000000e+00> : vector<8xf32>
    %70 = vector.multi_reduction <add>, %69, %cst_37 [1] : vector<8x8xf32> to vector<8xf32>
    %71 = vector.shape_cast %70 : vector<8xf32> to vector<8x1xf32>
    %72 = math.sqrt %71 : vector<8x1xf32>
    %73 = arith.negf %72 : vector<8x1xf32>
    %74 = math.exp %73 : vector<8x1xf32>
    %cst_38 = arith.constant 1.000000e+00 : f32
    %75 = vector.broadcast %cst_38 : f32 to vector<8x1xf32>
    %76 = arith.addf %75, %74 : vector<8x1xf32>
    %77 = arith.divf %75, %76 : vector<8x1xf32>
    %cst_39 = arith.constant 1.000000e+00 : f32
    %78 = vector.broadcast %cst_39 : f32 to vector<8x1xf32>
    %79 = arith.subf %78, %67 : vector<8x1xf32>
    %80 = arith.mulf %79, %77 : vector<8x1xf32>
    %81 = arith.mulf %80, %77 : vector<8x1xf32>
    %cst_40 = arith.constant 1.000000e+00 : f32
    %82 = vector.broadcast %cst_40 : f32 to vector<8x1xf32>
    %83 = arith.subf %82, %77 : vector<8x1xf32>
    %cst_41 = arith.constant 0.000000e+00 : f32
    %84 = vector.broadcast %cst_41 : f32 to vector<8x1xf32>
    %85 = arith.maximumf %83, %84 : vector<8x1xf32>
    %86 = arith.mulf %85, %85 : vector<8x1xf32>
    %87 = arith.mulf %67, %86 : vector<8x1xf32>
    %88 = arith.addf %81, %87 : vector<8x1xf32>
    %c0_42 = arith.constant 0 : index
    %c0_43 = arith.constant 0 : index
    %89 = vector.load %arg7[%c0_42, %c0_43] : memref<8x1xf32, #tpu.memory_space<vmem>>, vector<8x1xf32>
    tpu.vector_store %arg7[%c0_42, %c0_43], %88 {strides = array<i32>} : memref<8x1xf32, #tpu.memory_space<vmem>>, vector<8x1xf32>,
    return
  }
  func.func @transform_0(%arg0: i32) -> (i32, i32, i32) {
    %c0_i32 = arith.constant 0 : i32
    %c0_i32_0 = arith.constant 0 : i32
    %c0_i32_1 = arith.constant 0 : i32
    return %c0_i32, %arg0, %c0_i32_0 : i32, i32, i32
  }
  func.func @transform_1(%arg0: i32) -> (i32, i32, i32) {
    %c0_i32 = arith.constant 0 : i32
    %c0_i32_0 = arith.constant 0 : i32
    %c0_i32_1 = arith.constant 0 : i32
    return %c0_i32, %arg0, %c0_i32_0 : i32, i32, i32
  }
  func.func @transform_2(%arg0: i32) -> (i32, i32, i32) {
    %c0_i32 = arith.constant 0 : i32
    %c0_i32_0 = arith.constant 0 : i32
    %c0_i32_1 = arith.constant 0 : i32
    return %arg0, %c0_i32, %c0_i32_0 : i32, i32, i32
  }
  func.func @transform_3(%arg0: i32) -> (i32, i32, i32) {
    %c0_i32 = arith.constant 0 : i32
    %c0_i32_0 = arith.constant 0 : i32
    %c0_i32_1 = arith.constant 0 : i32
    return %arg0, %c0_i32, %c0_i32_0 : i32, i32, i32
  }
  func.func @transform_4(%arg0: i32) -> (i32, i32) {
    %c0_i32 = arith.constant 0 : i32
    %c0_i32_0 = arith.constant 0 : i32
    return %arg0, %c0_i32 : i32, i32
  }
  func.func @transform_5(%arg0: i32) -> (i32, i32) {
    %c0_i32 = arith.constant 0 : i32
    %c0_i32_0 = arith.constant 0 : i32
    return %arg0, %c0_i32 : i32, i32
  }
  func.func @transform_6(%arg0: i32) -> (i32, i32) {
    %c0_i32 = arith.constant 0 : i32
    %c0_i32_0 = arith.constant 0 : i32
    return %arg0, %c0_i32 : i32, i32
  }
}

</mosaic_0001>

<bundles_post_ra>
// kernel: tpu_custom_call.1
= control target key start
LH: loop header
LB: loop body
LE: loop exit
PB: predicated region body
PF: predicated region fallthrough
CT: control target
= control target key end

     0   :  { %s2237_s0 = inlined_call_operand.hbm [shape: f32[8,16,16], index: 0, kind: input, shape index: {}]   ;;  %s2238_s1 = inlined_call_operand.hbm [shape: f32[8,16,16], index: 1, kind: input, shape index: {}]   ;;  %s2239_s2 = inlined_call_operand.hbm [shape: f32[16,8,32], index: 2, kind: input, shape index: {}]   ;;  %s2240_s3 = inlined_call_operand.hbm [shape: f32[16,8,32], index: 3, kind: input, shape index: {}]   ;;  %s2241_s4 = inlined_call_operand.vmem [shape: f32[16,1], index: 4, kind: input, shape index: {}]   ;;  %s2242_s5 = inlined_call_operand.vmem [shape: f32[16,1], index: 5, kind: output, shape index: {0}]   ;;  %s2243_s6 = inlined_call_operand.vmem [shape: f32[16,1], index: 6, kind: output, shape index: {1}]  }
   0x1   :  { %2248 = sst [smem:[#allocation12_spill]] %s2237_s0 }
   0x2   :  { %2249 = sst [smem:[#allocation13_spill]] %s2238_s1 }
   0x3   :  { %12 = vsyncpa [#allocation3], 0 }
   0x4   :  { %14 = vsyncpa [#allocation3 + $0x1], 0 }
   0x5   :  { %15 = vsyncpa [#allocation5], 0 }
   0x6   :  { %17 = vsyncpa [#allocation5 + $0x1], 0 }
   0x7   :  { %18 = vsyncpa [#allocation8], 0 }
   0x8   :  { %20 = vsyncpa [#allocation8 + $0x1], 0  ;;  %s1729_s21 = smov 0   ;;  %s1731_s22 = smov 0  }
   0x9   :  { %s1733_s23 = smov 0   ;;  %s1735_s24 = smov 0  }
   0xa LB: > { %s1748_s25 = sadd.s32 4294967295, %s1685_s24   ;;  %s1751_s26 = sadd.s32 1, %s1685_s24   ;;  %s1685_s24 = sphi %s1735_s24, %s2264_s24   ;;  %s1681_s23 = sphi %s1733_s23, %s2263_s23   ;;  %s1677_s22 = sphi %s1731_s22, %s2262_s22   ;;  %s1673_s21 = sphi %s1729_s21, %s2261_s21  }
   0xb   : > { %s30_s27 = ssub.s32 %s1685_s24, %s1751_s26  ;;  %s33_s28 = sadd.s32 1, %s1681_s23 }
   0xc   : > { %p31_p0 = scmp.eq.s32.totalorder %s30_s27, 0  ;;  %p40_p1 = scmp.ne.s32.totalorder %s1681_s23, %s1677_s22 }
   0xd   : > { %p41_p2 = scmp.eq.s32.totalorder %s1685_s24, 0  ;;  %p46_p3 = scmp.ne.s32.totalorder %s1677_s22, %s1673_s21 }
   0xe   : > { %s1761_s29 = scalar_select %p31_p0, %s1681_s23, %s33_s28  }
   0xf   : > { %p42_p4 = por %p41_p2, %p40_p1  ;;  %p47_p5 = scmp.eq.s32.totalorder %s1748_s25, 0 }
  0x10   : > { %p1352_p6 = scmp.lt.s32.totalorder %s1685_s24, 2  ;;  %s1770_s7 = sand.u32 1, %s1681_s23  }
  0x11   : > { %p1765_p7 = por %p47_p5, %p46_p3  ;;  %s1773_s8 = sshll.u32 %s1770_s7, 6 }
  0x12   : > { %s1301_s9 = sshll.u32 %s1685_s24, 7  ;;  %p1776_p8 = pnand %p1352_p6, %p42_p4 }
  0x13   : > { %s2250_s30 = scalar_select %p1765_p7, 1, 0 }
  0x14   : > { %s246_s11 = sand.u32 1, %s1685_s24   ;;  %s2252_s1 = sld [smem:[#allocation13_spill]] }
  0x15   : > { %s250_s15 = scalar_lea.vmem [#allocation4], %s1773_s8  ;;  %s1792_s17 = scalar_lea.sflag [#allocation5], %s246_s11 }
  0x16   : > { %s256_s16 = sshll.u32 %s250_s15, 4  ;;  %p1798_p11 = pneg %p1776_p8  ;;  %s1789_s16 = int_to_ptr.vmem [resolvable:$true] %s256_s16 }
  0x1a   : > { %s1786_s14 = scalar_lea.hbm %s2252_s1, %s1301_s9  ;;  %s1528_s27 = scalar_lea.hbm %s2252_s1, 2048 }
  0x1b   : > { %s1523_s18 = scalar_lea.hbm %s1786_s14, 1024  ;;  %p1529_p0 = scmp.lt.u32.totalorder %s1786_s14, %s2252_s1 }
  0x1c   : > { %p1524_p10 = scmp.ne.s32.totalorder %s1786_s14, %s1523_s18  ;;  %p1530_p1 = scmp.lt.u32.totalorder %s1528_s27, %s1523_s18 }
  0x1d   : > { %p1532_p3 = scmp.lt.u32.totalorder %s1523_s18, %s1786_s14 }
  0x1e   : > { %p1526_p12 = pnand %p1798_p11, %p1524_p10  ;;  %p1531_p2 = por %p1530_p1, %p1529_p0 }
  0x20   : > { %p1527_p13 = pneg %p1526_p12  ;;  %p1533_p4 = por %p1532_p3, %p1531_p2 }
  0x22   : > { %p1534_p5 = pnand %p1533_p4, %p1527_p13 }
  0x24   : > { %1537 = shalt.err (!%p1534_p5)
}
  0x25   : > { %s1538_s11 = scalar_lea.vmem %s1789_s16, 1024  ;;  %s1687_s13 = smov [#allocation4]  }
  0x26   : > { %p1539_p6 = scmp.ne.s32.totalorder %s1789_s16, %s1538_s11  ;;  %s1543_s15 = sshll.u32 %s1687_s13, 4  ;;  %s1544_s15 = int_to_ptr.vmem [resolvable:$false] %s1543_s15 }
  0x27   : > { %s1545_s20 = scalar_lea.vmem %s1544_s15, 2048  ;;  %p1546_p9 = scmp.lt.s32.totalorder %s1789_s16, %s1544_s15 }
  0x28   : > { %p1541_p10 = pnand %p1539_p6, %p1798_p11  ;;  %p1547_p7 = scmp.lt.s32.totalorder %s1545_s20, %s1538_s11 }
  0x2a   : > { %p1542_p12 = pneg %p1541_p10  ;;  %p1548_p0 = por %p1547_p7, %p1546_p9 }
  0x2c   : > { %p1549_p1 = pnand %p1548_p0, %p1542_p12 }
  0x2e   : > { %1552 = shalt.err (!%p1549_p1)
}
  0x2f   : > { %s2245_s18 = smov 256   ;;  %s2246_s21 = smov 128  }
  0x30   : > { %s1690_s27 = smov 8   ;;  %p313_p7 = scmp.lt.s32.totalorder %s1685_s24, 3 }
  0x31   : > { %1345 = dma.hbm_to_vmem [thread:$0]  (!%p1776_p8), %s1786_s14, 1024, %s1789_s16, %s1792_s17, %s2245_s18, %s2246_s21, %s1690_s27  }
  0x32   : > { %s2254_s0 = sld [smem:[#allocation12_spill]]  ;;  %p2255_p9 = scmp.ge.s32.totalorder %s1685_s24, 1 }
  0x33   : > { %s230_s15 = scalar_lea.vmem [#allocation2], %s1773_s8  ;;  %s227_s14 = scalar_lea.sflag [#allocation3], %s1770_s7 }
  0x34   : > { %p1835_p13 = pnand %p2255_p9, %p313_p7  ;;  %s236_s20 = sshll.u32 %s230_s15, 4  ;;  %s1840_s20 = int_to_ptr.vmem [resolvable:$true] %s236_s20 }
  0x36   : > { %s2256_s13 = scalar_select %p1835_p13, 1, 0 }
  0x38   : > { %s1831_s11 = scalar_lea.hbm %s2254_s0, %s1301_s9  ;;  %s1558_s12 = scalar_lea.hbm %s2254_s0, 2048 }
  0x39   : > { %s1553_s16 = scalar_lea.hbm %s1831_s11, 1024  ;;  %p1559_p5 = scmp.lt.u32.totalorder %s1831_s11, %s2254_s0 }
  0x3a   : > { %p1554_p2 = scmp.ne.s32.totalorder %s1831_s11, %s1553_s16  ;;  %p1560_p6 = scmp.lt.u32.totalorder %s1558_s12, %s1553_s16 }
  0x3b   : > { %p1562_p12 = scmp.lt.u32.totalorder %s1553_s16, %s1831_s11 }
  0x3c   : > { %p1556_p3 = pnand %p1554_p2, %p1798_p11  ;;  %p1561_p10 = por %p1560_p6, %p1559_p5 }
  0x3e   : > { %p1557_p4 = pneg %p1556_p3  ;;  %p1563_p0 = por %p1562_p12, %p1561_p10 }
  0x40   : > { %p1564_p1 = pnand %p1563_p0, %p1557_p4 }
  0x42   : > { %1567 = shalt.err (!%p1564_p1)
}
  0x43   : > { %s1568_s15 = scalar_lea.vmem %s1840_s20, 1024  ;;  %s1691_s9 = smov [#allocation2]  }
  0x44   : > { %p1569_p7 = scmp.ne.s32.totalorder %s1840_s20, %s1568_s15  ;;  %s1573_s28 = sshll.u32 %s1691_s9, 4  ;;  %s1574_s28 = int_to_ptr.vmem [resolvable:$false] %s1573_s28 }
  0x45   : > { %s1575_s18 = scalar_lea.vmem %s1574_s28, 2048  ;;  %p1576_p3 = scmp.lt.s32.totalorder %s1840_s20, %s1574_s28 }
  0x46   : > { %p1571_p9 = pnand %p1569_p7, %p1798_p11  ;;  %p1577_p13 = scmp.lt.s32.totalorder %s1575_s18, %s1568_s15 }
  0x48   : > { %p1572_p2 = pneg %p1571_p9  ;;  %p1578_p5 = por %p1577_p13, %p1576_p3 }
  0x4a   : > { %p1579_p6 = pnand %p1578_p5, %p1572_p2 }
  0x4c   : > { %1582 = shalt.err (!%p1579_p6)
}
  0x4d   : > { %s2257_s21 = smov 128   ;;  %s2258_s16 = smov 256  }
  0x4e   : > { %1342 = dma.hbm_to_vmem [thread:$0]  (!%p1776_p8), %s1831_s11, 1024, %s1840_s20, %s227_s14, %s2258_s16, %s2257_s21, %s1690_s27  }
  0x4f   : > { %s1329_s12 = sshll.u32 %s1685_s24, 10  ;;  %s270_s9 = scalar_lea.vmem [#allocation6], %s1773_s8 }
  0x50   : > { %s277_s15 = sshll.u32 %s270_s9, 4  ;;  %s1876_s0 = scalar_lea.hbm %s2239_s2, %s1329_s12  ;;  %s1878_s15 = int_to_ptr.vmem [resolvable:$true] %s277_s15 }
  0x51   : > { %s1583_s1 = scalar_lea.hbm %s1876_s0, 1024  ;;  %s1588_s14 = scalar_lea.hbm %s2239_s2, 2048 }
  0x52   : > { %p1584_p13 = scmp.ne.s32.totalorder %s1876_s0, %s1583_s1  ;;  %p1589_p12 = scmp.lt.u32.totalorder %s1876_s0, %s2239_s2 }
  0x53   : > { %p1590_p0 = scmp.lt.u32.totalorder %s1588_s14, %s1583_s1  ;;  %p1592_p7 = scmp.lt.u32.totalorder %s1583_s1, %s1876_s0 }
  0x54   : > { %p1586_p4 = pnand %p1584_p13, %p1798_p11 }
  0x55   : > { %p1591_p1 = por %p1590_p0, %p1589_p12 }
  0x56   : > { %p1587_p10 = pneg %p1586_p4 }
  0x57   : > { %p1593_p9 = por %p1592_p7, %p1591_p1 }
  0x59   : > { %p1594_p2 = pnand %p1593_p9, %p1587_p10 }
  0x5b   : > { %1597 = shalt.err (!%p1594_p2)
}
  0x5c   : > { %s1598_s28 = scalar_lea.vmem %s1878_s15, 1024  ;;  %s1692_s18 = smov [#allocation6]  }
  0x5d   : > { %p1599_p3 = scmp.ne.s32.totalorder %s1878_s15, %s1598_s28  ;;  %s1603_s11 = sshll.u32 %s1692_s18, 4  ;;  %s1604_s11 = int_to_ptr.vmem [resolvable:$false] %s1603_s11 }
  0x5e   : > { %s1605_s20 = scalar_lea.vmem %s1604_s11, 2048  ;;  %p1606_p13 = scmp.lt.s32.totalorder %s1878_s15, %s1604_s11 }
  0x5f   : > { %p1601_p5 = pnand %p1599_p3, %p1798_p11  ;;  %p1607_p4 = scmp.lt.s32.totalorder %s1605_s20, %s1598_s28 }
  0x61   : > { %p1602_p6 = pneg %p1601_p5  ;;  %p1608_p12 = por %p1607_p4, %p1606_p13 }
  0x63   : > { %p1609_p0 = pnand %p1608_p12, %p1602_p6 }
  0x65   : > { %1612 = shalt.err (!%p1609_p0)
}
  0x66   : > { %1348 = dma.hbm_to_vmem [thread:$0]  (!%p1776_p8), %s1876_s0, 1024, %s1878_s15, %s1792_s17, %s2257_s21, %s2257_s21, %s1690_s27  }
  0x67   : > { %s1910_s16 = scalar_lea.hbm %s2240_s3, %s1329_s12  ;;  %s291_s9 = scalar_lea.vmem [#allocation7], %s1773_s8 }
  0x68   : > { %s298_s28 = sshll.u32 %s291_s9, 4  ;;  %s288_s18 = scalar_lea.sflag [#allocation8], %s1770_s7  ;;  %s1913_s28 = int_to_ptr.vmem [resolvable:$true] %s298_s28 }
  0x69   : > { %s1613_s11 = scalar_lea.hbm %s1910_s16, 1024  ;;  %s1618_s17 = scalar_lea.hbm %s2240_s3, 2048 }
  0x6a   : > { %p1614_p10 = scmp.ne.s32.totalorder %s1910_s16, %s1613_s11  ;;  %p1619_p9 = scmp.lt.u32.totalorder %s1910_s16, %s2240_s3 }
  0x6b   : > { %p1620_p2 = scmp.lt.u32.totalorder %s1618_s17, %s1613_s11  ;;  %p1622_p5 = scmp.lt.u32.totalorder %s1613_s11, %s1910_s16 }
  0x6c   : > { %p1616_p1 = pnand %p1614_p10, %p1798_p11 }
  0x6d   : > { %p1621_p3 = por %p1620_p2, %p1619_p9 }
  0x6e   : > { %p1617_p7 = pneg %p1616_p1 }
  0x6f   : > { %p1623_p6 = por %p1622_p5, %p1621_p3 }
  0x71   : > { %p1624_p13 = pnand %p1623_p6, %p1617_p7 }
  0x73   : > { %1627 = shalt.err (!%p1624_p13)
}
  0x74   : > { %s1628_s8 = scalar_lea.vmem %s1913_s28, 1024  ;;  %s1693_s20 = smov [#allocation7]  }
  0x75   : > { %p1629_p4 = scmp.ne.s32.totalorder %s1913_s28, %s1628_s8  ;;  %s1633_s1 = sshll.u32 %s1693_s20, 4  ;;  %s1634_s1 = int_to_ptr.vmem [resolvable:$false] %s1633_s1 }
  0x76   : > { %s1635_s14 = scalar_lea.vmem %s1634_s1, 2048  ;;  %p1636_p10 = scmp.lt.s32.totalorder %s1913_s28, %s1634_s1 }
  0x77   : > { %p1631_p12 = pnand %p1629_p4, %p1798_p11  ;;  %p1637_p1 = scmp.lt.s32.totalorder %s1635_s14, %s1628_s8 }
  0x79   : > { %p1632_p0 = pneg %p1631_p12  ;;  %p1638_p9 = por %p1637_p1, %p1636_p10 }
  0x7b   : > { %p1639_p2 = pnand %p1638_p9, %p1632_p0 }
  0x7d   : > { %1642 = shalt.err (!%p1639_p2)
}
  0x7e   : > { %1351 = dma.hbm_to_vmem [thread:$0]  (!%p1776_p8), %s1910_s16, 1024, %s1913_s28, %s288_s18, %s2257_s21, %s2257_s21, %s1690_s27  }
  0x7f   : > { %p2259_p11 = scmp.ne.s32.totalorder %s2256_s13, 0 }
  0x80   : > { %s319_s19 = sand.u32 (!%p2259_p11), 1, %s1677_s22   ;;  %p2260_p7 = scmp.ne.s32.totalorder (!%p2259_p11), %s2250_s30, 0 }
  0x81   : > { %317 = sbr.rel (%p2259_p11) target bundleno = 696 (0x2b8), region = 40  ;;  %s1311_s9 = sshll.u32 (!%p2259_p11), %s319_s19, 6 }
  0x82   : > { %s320_s11 = scalar_lea.sflag (!%p2259_p11), [#allocation3], %s319_s19  ;;  %s1945_s0 = scalar_lea.vmem (!%p2259_p11), [#allocation2], %s1311_s9 }
  0x88   : > { %1660 = dma.done.wait (%p2260_p7), %s320_s11, 1024  }
  0x89   : > { %1662 = vsyncadd (%p2260_p7), %s320_s11, 4294966272  ;;  %s328_s7 = sand.u32 1, %s1748_s25   ;;  %s1952_s27 = scalar_lea.vmem [#allocation4], %s1311_s9 }
  0x8a   : > { %s329_s10 = scalar_lea.sflag [#allocation5], %s328_s7 }
  0x8b   : > { %1664 = dma.done.wait (%p2260_p7), %s329_s10, 2048  }
  0x8c   : > { %1666 = vsyncadd (%p2260_p7), %s329_s10, 4294965248  ;;  %s1958_s13 = scalar_lea.vmem [#allocation6], %s1311_s9  ;;  %s347_s21 = scalar_lea.sflag [#allocation8], %s319_s19 }
  0x8d   : > { %s1960_s16 = scalar_lea.vmem [#allocation7], %s1311_s9 }
  0x8e   : > { %1668 = dma.done.wait (%p2260_p7), %s347_s21, 1024  }
  0x8f   : > { %1670 = vsyncadd (%p2260_p7), %s347_s21, 4294966272  ;;  %v690_v0 = vld [vmem:[%s1958_s13] sm:$0xff]  ;;  %vm714_vm0 = vcmask 261120   ;;  %v692_v1 = vld [vmem:[%s1958_s13 + $0x10] sm:$0xff]  ;;  %vm487_vm1 = vcmask 130048   ;;  %vm643_vm2 = vcmask 1041409  }
  0x90   : > { %v691_v2 = vld [vmem:[%s1958_s13 + $0x8] sm:$0xff]  ;;  %v706_v3 = vmul.f32 %v690_v0, %v690_v0  ;;  %v708_v4 = vmul.f32 %v692_v1, %v692_v1  ;;  %v1970_v6 = vld [vmem:[%s1952_s27] sm:$0xff]  ;;  %v693_v7 = vld [vmem:[%s1958_s13 + $0x18] sm:$0xff]  ;;  %vm645_vm3 = vcmask 1042434   ;;  %vm647_vm4 = vcmask 1043459   ;;  %p403_p8 = scmp.lt.s32.totalorder %s1748_s25, 1 }
  0x91   : > { %v707_v5 = vmul.f32 %v691_v2, %v691_v2  ;;  %1389 = vrcp.f32 %v1970_v6  ;;  %v709_v8 = vmul.f32 %v693_v7, %v693_v7  ;;  %v1975_v9 = vld [vmem:[%s1952_s27 + $0x8] sm:$0xff]  ;;  %v1982_v13 = vld [vmem:[%s1952_s27 + $0x10] sm:$0xff]  ;;  %v1986_v14 = vld [vmem:[%s1952_s27 + $0x18] sm:$0xff]  ;;  %vm649_vm5 = vcmask 1044484  }
  0x92   : > { %v699_v10 = vld [vmem:[%s1960_s16 + $0x8] sm:$0xff]  ;;  %v715_v11 = vsel %vm714_vm0, %v706_v3, 0.0  ;;  %1391 = vrcp.f32 %v1975_v9  ;;  %v1989_v15 = vld [vmem:[%s1952_s27 + $0x20] sm:$0xff]  ;;  %v721_v17 = vsel %vm714_vm0, %v708_v4, 0.0  ;;  %v2003_v22 = vld [vmem:[%s1952_s27 + $0x30] sm:$0xff]  ;;  %vm651_vm6 = vcmask 1045509  }
  0x93   : > { %v718_v12 = vsel %vm714_vm0, %v707_v5, 0.0  ;;  %716 = vadd.xlane.f32.xlu0 %v715_v11  ;;  %1393 = vrcp.f32 %v1982_v13  ;;  %v772_v16 = vmul.f32 %v699_v10, %v691_v2  ;;  %v724_v18 = vsel %vm714_vm0, %v709_v8, 0.0  ;;  %v1995_v20 = vld [vmem:[%s1952_s27 + $0x28] sm:$0xff]  ;;  %v2007_v24 = vld [vmem:[%s1945_s0] sm:$0xff]  ;;  %v2014_v26 = vld [vmem:[%s1952_s27 + $0x38] sm:$0xff]  ;;  %s2266_s25 = smov (!%p403_p8, %s1748_s25), 1 }
  0x94   : > { %719 = vadd.xlane.f32.xlu1 %v718_v12  ;;  %v740_v19 = vmul.f32 %v699_v10, %v699_v10  ;;  %1395 = vrcp.f32 %v1986_v14  ;;  %v2011_v25 = vld [vmem:[%s1945_s0 + $0x8] sm:$0xff]  ;;  %v2017_v27 = vld [vmem:[%s1960_s16] sm:$0xff]  ;;  %v2020_v29 = vld [vmem:[%s1945_s0 + $0x10] sm:$0xff]  ;;  %vm653_vm7 = vcmask 1046534   ;;  %vm655_vm8 = vcmask 1047559   ;;  %s2208_s30 = sshll.u32 %s2266_s25, 3 }
  0x95   : > { %1397 = vrcp.f32 %v1989_v15  ;;  %v1999_v21 = vsel %vm714_vm0, %v772_v16, 0.0  ;;  %v2023_v30 = vld [vmem:[%s1960_s16 + $0x10] sm:$0xff]  ;;  %v771_v31 = vmul.f32 %v2017_v27, %v690_v0  ;;  %v2028_v34 = vld [vmem:[%s1945_s0 + $0x18] sm:$0xff]  ;;  %v2033_v38 = vld [vmem:[%s1945_s0 + $0x20] sm:$0xff]  ;;  %vm1041_vm9 = vcmask 64512   ;;  %s410_s24 = scalar_lea.vmem %s2242_s5, %s2208_s30  ;;  %s406_s12 = scalar_lea.vmem %s2241_s4, %s2208_s30 }
  0x96   : > { %1399 = vrcp.f32 %v1995_v20  ;;  %v750_v23 = vsel %vm714_vm0, %v740_v19, 0.0  ;;  %v773_v35 = vmul.f32 %v2023_v30, %v692_v1  ;;  %v2041_v43 = vld [vmem:[%s1945_s0 + $0x28] sm:$0xff]  ;;  %v2045_v47 = vld [vmem:[%s1960_s16 + $0x18] sm:$0xff]  ;;  %v2057_v58 = vld [vmem:[%s1945_s0 + $0x30] sm:$0xff]  ;;  %vm1045_vm10 = vcmask 7168   ;;  %s414_s20 = scalar_lea.vmem %s2243_s6, %s2208_s30 }
  0x97   : > { %722 = vadd.xlane.f32.xlu0 %v721_v17  ;;  %1401 = vrcp.f32 %v2003_v22  ;;  %v2037_v39 = vsel %vm714_vm0, %v771_v31, 0.0  ;;  %v774_v52 = vmul.f32 %v2045_v47, %v693_v7  ;;  %v2061_v62 = vld [vmem:[%s1945_s0 + $0x38] sm:$0xff] }
  0x98   : > { %725 = vadd.xlane.f32.xlu1 %v724_v18  ;;  %1403 = vrcp.f32 %v2014_v26  ;;  %v2048_v48 = vsel %vm714_vm0, %v773_v35, 0.0 }
  0x99   : > { %v2054_v55 = vsel %vm714_vm0, %v774_v52, 0.0 }
  0x9b   : > { %v1390_v28 = vpop.eup %1389 }
  0x9c   : > { %751 = vadd.xlane.f32.xlu1 %v750_v23  ;;  %v1392_v32 = vpop.eup %1391  ;;  %v439_v33 = vmul.f32 %v1390_v28, %v2007_v24 }
  0x9d   : > { %v1394_v36 = vpop.eup %1393  ;;  %v440_v37 = vmul.f32 %v1392_v32, %v2011_v25 }
  0x9e   : > { %v1396_v40 = vpop.eup %1395  ;;  %v455_v41 = vadd.f32 1e-10, %v439_v33  ;;  %1405 = vrcp.f32 %v439_v33  ;;  %v441_v42 = vmul.f32 %v1394_v36, %v2020_v29 }
  0x9f   : > { %v1398_v44 = vpop.eup %1397  ;;  %1407 = vrcp.f32 %v440_v37  ;;  %v456_v45 = vadd.f32 1e-10, %v440_v37  ;;  %v442_v46 = vmul.f32 %v1396_v40, %v2028_v34 }
  0xa0   : > { %v1400_v49 = vpop.eup %1399  ;;  %1409 = vlog2.f32 %v455_v41  ;;  %v457_v50 = vadd.f32 1e-10, %v441_v42  ;;  %v443_v51 = vmul.f32 %v1398_v44, %v2033_v38 }
  0xa1   : > { %1411 = vlog2.f32 %v456_v45  ;;  %v458_v53 = vadd.f32 1e-10, %v442_v46  ;;  %v444_v54 = vmul.f32 %v1400_v49, %v2041_v43  ;;  %v1402_v56 = vpop.eup %1401 }
  0xa2   : > { %1413 = vrcp.f32 %v441_v42  ;;  %v459_v57 = vadd.f32 1e-10, %v443_v51  ;;  %v445_v60 = vmul.f32 %v1402_v56, %v2057_v58  ;;  %v1404_v61 = vpop.eup %1403 }
  0xa3   : > { %1415 = vlog2.f32 %v457_v50  ;;  %v460_v59 = vadd.f32 1e-10, %v444_v54  ;;  %v446_v4 = vmul.f32 %v1404_v61, %v2061_v62 }
  0xa4   : > { %1417 = vrcp.f32 %v442_v46  ;;  %v461_v11 = vadd.f32 1e-10, %v445_v60 }
  0xa5   : > { %1419 = vlog2.f32 %v458_v53  ;;  %v462_v36 = vadd.f32 1e-10, %v446_v4 }
  0xa6   : > { %1421 = vrcp.f32 %v443_v51 }
  0xa7   : > { %1423 = vlog2.f32 %v459_v57 }
  0xa8   : > { %v1406_v63 = vpop.eup %1405  ;;  %1425 = vrcp.f32 %v444_v54 }
  0xa9   : > { %v1408_v0 = vpop.eup %1407  ;;  %v521_v1 = vadd.f32 1e-10, %v1406_v63  ;;  %1427 = vlog2.f32 %v460_v59 }
  0xaa   : > { %v1410_v2 = vpop.eup %1409  ;;  %v522_v3 = vadd.f32 1e-10, %v1408_v0  ;;  %1429 = vrcp.f32 %v445_v60 }
  0xab   : > { %v1412_v5 = vpop.eup %1411  ;;  %v464_v7 = vmul.f32 0.6931472, %v1410_v2  ;;  %1431 = vlog2.f32 %v521_v1 }
  0xac   : > { %v1414_v8 = vpop.eup %1413  ;;  %v466_v10 = vmul.f32 0.6931472, %v1412_v5  ;;  %1433 = vlog2.f32 %v522_v3 }
  0xad   : > { %v1416_v12 = vpop.eup %1415  ;;  %v479_v16 = vmul.f32 %v464_v7, %v2007_v24  ;;  %v523_v17 = vadd.f32 1e-10, %v1414_v8  ;;  %1435 = vrcp.f32 %v446_v4 }
  0xae   : > { %v1418_v18 = vpop.eup %1417  ;;  %v480_v19 = vmul.f32 %v466_v10, %v2011_v25  ;;  %v468_v23 = vmul.f32 0.6931472, %v1416_v12 }
  0xaf   : > { %v1420_v28 = vpop.eup %1419  ;;  %v488_v31 = vsel %vm487_vm1, %v479_v16, 0.0  ;;  %1437 = vlog2.f32 %v523_v17  ;;  %v524_v32 = vadd.f32 1e-10, %v1418_v18 }
  0xb0   : > { %v1422_v33 = vpop.eup %1421  ;;  %489 = vadd.xlane.f32.xlu0 %v488_v31  ;;  %v491_v35 = vsel %vm487_vm1, %v480_v19, 0.0  ;;  %1439 = vlog2.f32 %v461_v11  ;;  %v481_v24 = vmul.f32 %v468_v23, %v2020_v29  ;;  %v470_v40 = vmul.f32 0.6931472, %v1420_v28 }
  0xb1   : > { %v1424_v37 = vpop.eup %1423  ;;  %1441 = vlog2.f32 %v524_v32  ;;  %v525_v41 = vadd.f32 1e-10, %v1422_v33 }
  0xb2   : > { %v1426_v25 = vpop.eup %1425  ;;  %v494_v49 = vsel %vm487_vm1, %v481_v24, 0.0  ;;  %v482_v50 = vmul.f32 %v470_v40, %v2028_v34  ;;  %v472_v51 = vmul.f32 0.6931472, %v1424_v37  ;;  %v694_v40 = vld [vmem:[%s1958_s13 + $0x20] sm:$0xff] }
  0xb3   : > { %v1428_v42 = vpop.eup %1427  ;;  %1443 = vlog2.f32 %v525_v41  ;;  %v526_v44 = vadd.f32 1e-10, %v1426_v25 }
  0xb4   : > { %v1430_v45 = vpop.eup %1429  ;;  %492 = vadd.xlane.f32.xlu0 %v491_v35  ;;  %1445 = vlog2.f32 %v462_v36  ;;  %v497_v60 = vsel %vm487_vm1, %v482_v50, 0.0  ;;  %v483_v63 = vmul.f32 %v472_v51, %v2033_v38  ;;  %v474_v0 = vmul.f32 0.6931472, %v1428_v42  ;;  %v696_v50 = vld [vmem:[%s1958_s13 + $0x30] sm:$0xff] }
  0xb5   : > { %v1432_v46 = vpop.eup %1431  ;;  %1447 = vlog2.f32 %v526_v44  ;;  %v527_v29 = vadd.f32 1e-10, %v1430_v45  ;;  %v695_v44 = vld [vmem:[%s1958_s13 + $0x28] sm:$0xff]  ;;  %v741_v51 = vmul.f32 %v2023_v30, %v2023_v30 }
  0xb6   : > { %v1434_v52 = vpop.eup %1433  ;;  %v530_v53 = vmul.f32 0.6931472, %v1432_v46  ;;  %v484_v38 = vmul.f32 %v474_v0, %v2041_v43 }
  0xb7   : > { %v532_v54 = vmul.f32 0.6931472, %v1434_v52  ;;  %v1436_v56 = vpop.eup %1435  ;;  %1449 = vlog2.f32 %v527_v29  ;;  %v742_v29 = vmul.f32 %v2045_v47, %v2045_v47 }
  0xb8   : > { %495 = vadd.xlane.f32.xlu0 %v494_v49  ;;  %v545_v57 = vmul.f32 %v530_v53, %v1970_v6  ;;  %v528_v4 = vadd.f32 1e-10, %v1436_v56  ;;  %v503_v19 = vsel %vm487_vm1, %v484_v38, 0.0  ;;  %v711_v49 = vmul.f32 %v695_v44, %v695_v44 }
  0xb9   : > { %v1438_v59 = vpop.eup %1437  ;;  %v546_v61 = vmul.f32 %v532_v54, %v1975_v9  ;;  %v500_v9 = vsel %vm487_vm1, %v483_v63, 0.0  ;;  %v712_v53 = vmul.f32 %v696_v50, %v696_v50  ;;  %v697_v54 = vld [vmem:[%s1958_s13 + $0x38] sm:$0xff]  ;;  %v756_v30 = vsel %vm714_vm0, %v742_v29, 0.0 }
  0xba   : > { %v1440_v1 = vpop.eup %1439  ;;  %v553_v34 = vsel %vm487_vm1, %v545_v57, 0.0  ;;  %v534_v2 = vmul.f32 0.6931472, %v1438_v59  ;;  %1451 = vlog2.f32 %v528_v4  ;;  %v730_v52 = vsel %vm714_vm0, %v711_v49, 0.0  ;;  %v702_v59 = vld [vmem:[%s1960_s16 + $0x20] sm:$0xff] }
  0xbb   : > { %v1442_v3 = vpop.eup %1441  ;;  %554 = vadd.xlane.f32.xlu1 %v553_v34  ;;  %v556_v5 = vsel %vm487_vm1, %v546_v61, 0.0  ;;  %v476_v10 = vmul.f32 0.6931472, %v1440_v1  ;;  %v733_v56 = vsel %vm714_vm0, %v712_v53, 0.0  ;;  %v713_v57 = vmul.f32 %v697_v54, %v697_v54  ;;  %v703_v1 = vld [vmem:[%s1960_s16 + $0x28] sm:$0xff] }
  0xbc   : > { %498 = vadd.xlane.f32.xlu0 %v497_v60  ;;  %v547_v6 = vmul.f32 %v534_v2, %v1982_v13  ;;  %v536_v7 = vmul.f32 0.6931472, %v1442_v3  ;;  %v704_v60 = vld [vmem:[%s1960_s16 + $0x30] sm:$0xff]  ;;  %v743_v61 = vmul.f32 %v702_v59, %v702_v59  ;;  %v744_v47 = vmul.f32 %v703_v1, %v703_v1  ;;  %v705_v3 = vld [vmem:[%s1960_s16 + $0x38] sm:$0xff] }
  0xbd   : > { %v1444_v8 = vpop.eup %1443  ;;  %v485_v13 = vmul.f32 %v476_v10, %v2057_v58  ;;  %v736_v63 = vsel %vm714_vm0, %v713_v57, 0.0  ;;  %v745_v0 = vmul.f32 %v704_v60, %v704_v60  ;;  %v776_v38 = vmul.f32 %v703_v1, %v695_v44 }
  0xbe   : > { %v1446_v11 = vpop.eup %1445  ;;  %v559_v12 = vsel %vm487_vm1, %v547_v6, 0.0  ;;  %v548_v16 = vmul.f32 %v536_v7, %v1986_v14  ;;  %v538_v17 = vmul.f32 0.6931472, %v1444_v8  ;;  %v759_v34 = vsel %vm714_vm0, %v743_v61, 0.0 }
  0xbf   : > { %557 = vadd.xlane.f32.xlu1 %v556_v5  ;;  %v1448_v18 = vpop.eup %1447  ;;  %v478_v23 = vmul.f32 0.6931472, %v1446_v11  ;;  %v506_v33 = vsel %vm487_vm1, %v485_v13, 0.0  ;;  %v765_v2 = vsel %vm714_vm0, %v745_v0, 0.0  ;;  %v762_v4 = vsel %vm714_vm0, %v744_v47, 0.0 }
  0xc0   : > { %501 = vadd.xlane.f32.xlu0 %v500_v9  ;;  %v562_v43 = vsel %vm487_vm1, %v548_v16, 0.0  ;;  %v549_v28 = vmul.f32 %v538_v17, %v1989_v15  ;;  %v540_v31 = vmul.f32 0.6931472, %v1448_v18  ;;  %v739_v15 = vmul.f32 %v2017_v27, %v2017_v27 }
  0xc1   : > { %v1450_v32 = vpop.eup %1449  ;;  %v486_v14 = vmul.f32 %v478_v23, %v2061_v62  ;;  %v746_v5 = vmul.f32 %v705_v3, %v705_v3  ;;  %v775_v7 = vmul.f32 %v702_v59, %v694_v40  ;;  %v777_v9 = vmul.f32 %v704_v60, %v696_v50 }
  0xc2   : > { %v565_v35 = vsel %vm487_vm1, %v549_v28, 0.0  ;;  %v550_v58 = vmul.f32 %v540_v31, %v1995_v20  ;;  %v542_v36 = vmul.f32 0.6931472, %v1450_v32  ;;  %v747_v42 = vsel %vm714_vm0, %v739_v15, 0.0 }
  0xc3   : > { %560 = vadd.xlane.f32.xlu1 %v559_v12  ;;  %v509_v24 = vsel %vm487_vm1, %v486_v14, 0.0  ;;  %v710_v20 = vmul.f32 %v694_v40, %v694_v40  ;;  %v768_v6 = vsel %vm714_vm0, %v746_v5, 0.0  ;;  %v791_v8 = vsel %vm714_vm0, %v775_v7, 0.0 }
  0xc4   : > { %504 = vadd.xlane.f32.xlu0 %v503_v19  ;;  %v1452_v37 = vpop.eup %1451  ;;  %v568_v62 = vsel %vm487_vm1, %v550_v58, 0.0  ;;  %v551_v41 = vmul.f32 %v542_v36, %v2003_v22  ;;  %v797_v10 = vsel %vm714_vm0, %v777_v9, 0.0  ;;  %v794_v11 = vsel %vm714_vm0, %v776_v38, 0.0 }
  0xc5   : > { %v544_v25 = vmul.f32 0.6931472, %v1452_v37  ;;  %v727_v46 = vsel %vm714_vm0, %v710_v20, 0.0 }
  0xc6   : > { %v571_v45 = vsel %vm487_vm1, %v551_v41, 0.0 }
  0xc7   : > { %563 = vadd.xlane.f32.xlu1 %v562_v43  ;;  %v552_v27 = vmul.f32 %v544_v25, %v2014_v26  ;;  %v753_v26 = vsel %vm714_vm0, %v741_v51, 0.0 }
  0xc8   : > { %507 = vadd.xlane.f32.xlu0 %v506_v33 }
  0xc9   : > { %v574_v22 = vsel %vm487_vm1, %v552_v27, 0.0 }
  0xcb   : > { %566 = vadd.xlane.f32.xlu1 %v565_v35 }
  0xcc   : > { %510 = vadd.xlane.f32.xlu0 %v509_v24  ;;  %v609_v24 = vlaneseq }
  0xce   : > { %v610_v49 = vand.u32 127, %v609_v24  ;;  %v612_v51 = vshrl.u32 %v609_v24, 7 }
  0xcf   : > { %569 = vadd.xlane.f32.xlu1 %v568_v62 }
  0xd0   : > { %748 = vadd.xlane.f32.xlu0 %v747_v42  ;;  %v2139_v61 = vsub.s32 %v610_v49, %v612_v51 }
  0xd3   : > { %572 = vadd.xlane.f32.xlu1 %v571_v45 }
  0xd4   : > { %728 = vadd.xlane.f32.xlu0 %v727_v46 }
  0xd7   : > { %575 = vadd.xlane.f32.xlu1 %v574_v22 }
  0xd8   : > { %731 = vadd.xlane.f32.xlu0 %v730_v52 }
  0xdb   : > { %754 = vadd.xlane.f32.xlu1 %v753_v26 }
  0xdc   : > { %734 = vadd.xlane.f32.xlu0 %v733_v56 }
  0xdf   : > { %757 = vadd.xlane.f32.xlu1 %v756_v30 }
  0xe0   : > { %737 = vadd.xlane.f32.xlu0 %v736_v63 }
  0xe3   : > { %760 = vadd.xlane.f32.xlu1 %v759_v34 }
  0xe4   : > { %766 = vadd.xlane.f32.xlu0 %v765_v2 }
  0xe7   : > { %763 = vadd.xlane.f32.xlu1 %v762_v4 }
  0xe8   : > { %780 = vadd.xlane.f32.xlu0 %v2037_v39  ;;  %v778_v39 = vmul.f32 %v705_v3, %v697_v54 }
  0xea   : > { %v800_v12 = vsel %vm714_vm0, %v778_v39, 0.0 }
  0xeb   : > { %769 = vadd.xlane.f32.xlu1 %v768_v6 }
  0xec   : > { %786 = vadd.xlane.f32.xlu0 %v2048_v48 }
  0xef   : > { %783 = vadd.xlane.f32.xlu1 %v1999_v21 }
  0xf0   : > { %792 = vadd.xlane.f32.xlu0 %v791_v8 }
  0xf3   : > { %789 = vadd.xlane.f32.xlu1 %v2054_v55 }
  0xf4   : > { %798 = vadd.xlane.f32.xlu0 %v797_v10 }
  0xf7   : > { %795 = vadd.xlane.f32.xlu1 %v794_v11 }
  0xfb   : > { %801 = vadd.xlane.f32.xlu1 %v800_v12 }
 0x120   : > { %v2129_v48 = vpop.xlane.xlu0 %716 }
 0x121   : > { %v2131_v16 = vpop.xlane.xlu1 %719  ;;  %v803_v39 = vmax.f32 %v2129_v48, 1e-24 }
 0x122   : > { %v804_v24 = vmax.f32 %v2131_v16, 1e-24 }
 0x123   : > { %1453 = vrsqrt.f32 %v803_v39 }
 0x124   : > { %v2133_v17 = vpop.xlane.xlu0 %722 }
 0x125   : > { %v2135_v21 = vpop.xlane.xlu1 %725 }
 0x129   : > { %v2137_v13 = vpop.xlane.xlu1 %751 }
 0x12d   : > { %v1454_v49 = vpop.eup %1453 }
 0x13d   : > { %v490_v18 = vpop.xlane.xlu0 %489 }
 0x13e   : > { %v513_v62 = vmul.f32 0.0625, %v490_v18 }
 0x141   : > { %v493_v19 = vpop.xlane.xlu0 %492 }
 0x142   : > { %v514_v58 = vmul.f32 0.0625, %v493_v19 }
 0x145   : > { %v496_v55 = vpop.xlane.xlu0 %495 }
 0x146   : > { %v515_v37 = vmul.f32 0.0625, %v496_v55 }
 0x148   : > { %v555_v23 = vpop.xlane.xlu1 %554 }
 0x149   : > { %v499_v43 = vpop.xlane.xlu0 %498  ;;  %v577_v41 = vmul.f32 0.0625, %v555_v23 }
 0x14a   : > { %v516_v25 = vmul.f32 0.0625, %v499_v43 }
 0x14b   : > { %v585_v52 = vadd.f32 %v577_v41, %v513_v62 }
 0x14c   : > { %v558_v28 = vpop.xlane.xlu1 %557 }
 0x14d   : > { %v502_v31 = vpop.xlane.xlu0 %501  ;;  %v578_v36 = vmul.f32 0.0625, %v558_v28  ;;  %v593_v63 = vmul.f32 0.5, %v585_v52 }
 0x14e   : > { %v517_v44 = vmul.f32 0.0625, %v502_v31 }
 0x14f   : > { %v586_v27 = vadd.f32 %v578_v36, %v514_v58  ;;  %v614_v8 = vrot.slane %v593_v63, %v2139_v61 }
 0x150   : > { %v561_v32 = vpop.xlane.xlu1 %560 }
 0x151   : > { %v505_v33 = vpop.xlane.xlu0 %504  ;;  %v579_v15 = vmul.f32 0.0625, %v561_v32  ;;  %v594_v56 = vmul.f32 0.5, %v586_v27 }
 0x152   : > { %v518_v46 = vmul.f32 0.0625, %v505_v33 }
 0x153   : > { %v587_v50 = vadd.f32 %v579_v15, %v515_v37  ;;  %v618_v2 = vrot.slane %v594_v56, %v2139_v61 }
 0x154   : > { %v564_v14 = vpop.xlane.xlu1 %563 }
 0x155   : > { %v508_v35 = vpop.xlane.xlu0 %507  ;;  %v580_v42 = vmul.f32 0.0625, %v564_v14  ;;  %v595_v60 = vmul.f32 0.5, %v587_v50  ;;  %v644_v18 = vsel %vm643_vm2, %v618_v2, %v614_v8  ;;  %v805_v14 = vmax.f32 %v2133_v17, 1e-24 }
 0x156   : > { %v519_v57 = vmul.f32 0.0625, %v508_v35  ;;  %v806_v17 = vmax.f32 %v2135_v21, 1e-24 }
 0x157   : > { %v588_v53 = vadd.f32 %v580_v42, %v516_v25  ;;  %v622_v6 = vrot.slane %v595_v60, %v2139_v61  ;;  %v828_v42 = vmax.f32 %v2137_v13, 1e-24 }
 0x158   : > { %v567_v40 = vpop.xlane.xlu1 %566 }
 0x159   : > { %v511_v20 = vpop.xlane.xlu0 %510  ;;  %v581_v45 = vmul.f32 0.0625, %v567_v40  ;;  %v596_v0 = vmul.f32 0.5, %v588_v53  ;;  %v646_v43 = vsel %vm645_vm3, %v622_v6, %v644_v18 }
 0x15a   : > { %v520_v3 = vmul.f32 0.0625, %v511_v20 }
 0x15b   : > { %v589_v29 = vadd.f32 %v581_v45, %v517_v44  ;;  %v626_v9 = vrot.slane %v596_v0, %v2139_v61 }
 0x15c   : > { %v570_v22 = vpop.xlane.xlu1 %569 }
 0x15d   : > { %v582_v54 = vmul.f32 0.0625, %v570_v22  ;;  %v749_v26 = vpop.xlane.xlu0 %748  ;;  %v597_v47 = vmul.f32 0.5, %v589_v29  ;;  %v648_v48 = vsel %vm647_vm4, %v626_v9, %v646_v43 }
 0x15e   : > { %v827_v55 = vmax.f32 %v749_v26, 1e-24 }
 0x15f   : > { %v590_v59 = vadd.f32 %v582_v54, %v518_v46  ;;  %v630_v12 = vrot.slane %v597_v47, %v2139_v61 }
 0x160   : > { %v573_v30 = vpop.xlane.xlu1 %572  ;;  %1455 = vrsqrt.f32 %v827_v55 }
 0x161   : > { %v583_v1 = vmul.f32 0.0625, %v573_v30  ;;  %v729_v34 = vpop.xlane.xlu0 %728  ;;  %v598_v4 = vmul.f32 0.5, %v590_v59  ;;  %v650_v35 = vsel %vm649_vm5, %v630_v12, %v648_v48  ;;  %1457 = vrsqrt.f32 %v805_v14 }
 0x162   : > { %v807_v62 = vmax.f32 %v729_v34, 1e-24 }
 0x163   : > { %v591_v5 = vadd.f32 %v583_v1, %v519_v57  ;;  %v634_v19 = vrot.slane %v598_v4, %v2139_v61 }
 0x164   : > { %v576_v7 = vpop.xlane.xlu1 %575 }
 0x165   : > { %v599_v38 = vmul.f32 0.5, %v591_v5  ;;  %v584_v10 = vmul.f32 0.0625, %v576_v7  ;;  %v732_v11 = vpop.xlane.xlu0 %731  ;;  %v652_v37 = vsel %vm651_vm6, %v634_v19, %v650_v35 }
 0x166   : > { %v808_v50 = vmax.f32 %v732_v11, 1e-24 }
 0x167   : > { %v592_v23 = vadd.f32 %v584_v10, %v520_v3  ;;  %v638_v28 = vrot.slane %v599_v38, %v2139_v61 }
 0x168   : > { %v755_v31 = vpop.xlane.xlu1 %754 }
 0x169   : > { %v600_v32 = vmul.f32 0.5, %v592_v23  ;;  %v735_v33 = vpop.xlane.xlu0 %734  ;;  %v829_v58 = vmax.f32 %v755_v31, 1e-24  ;;  %v654_v40 = vsel %vm653_vm7, %v638_v28, %v652_v37 }
 0x16a   : > { %v809_v44 = vmax.f32 %v735_v33, 1e-24  ;;  %v1456_v51 = vpop.eup %1455 }
 0x16b   : > { %v642_v36 = vrot.slane %v600_v32, %v2139_v61  ;;  %1459 = vrsqrt.f32 %v829_v58  ;;  %v1458_v53 = vpop.eup %1457 }
 0x16c   : > { %v758_v15 = vpop.xlane.xlu1 %757  ;;  %1461 = vrsqrt.f32 %v804_v24 }
 0x16d   : > { %v738_v41 = vpop.xlane.xlu0 %737  ;;  %v656_v25 = vsel %vm655_vm8, %v642_v36, %v654_v40  ;;  %1463 = vrsqrt.f32 %v807_v62  ;;  %v830_v27 = vmax.f32 %v758_v15, 1e-24 }
 0x16e   : > { %658 = vxpose.xlu0.b32.start.end [1/1] (short) (narrow) %v656_v25, 8  ;;  %1465 = vrsqrt.f32 %v806_v17  ;;  %v810_v54 = vmax.f32 %v738_v41, 1e-24 }
 0x16f   : > { %1467 = vrsqrt.f32 %v828_v42 }
 0x170   : > { %v761_v20 = vpop.xlane.xlu1 %760 }
 0x171   : > { %v831_v45 = vmax.f32 %v761_v20, 1e-24  ;;  %v767_v16 = vpop.xlane.xlu0 %766 }
 0x172   : > { %v833_v46 = vmax.f32 %v767_v16, 1e-24 }
 0x173   : > { %1469 = vrsqrt.f32 %v831_v45 }
 0x174   : > { %v764_v22 = vpop.xlane.xlu1 %763  ;;  %1471 = vrsqrt.f32 %v809_v44 }
 0x175   : > { %v781_v21 = vpop.xlane.xlu0 %780  ;;  %1473 = vrsqrt.f32 %v830_v27  ;;  %v832_v52 = vmax.f32 %v764_v22, 1e-24  ;;  %v1460_v56 = vpop.eup %1459 }
 0x176   : > { %v819_v13 = vmul.f32 %v1454_v49, %v781_v21  ;;  %1475 = vrsqrt.f32 %v833_v46  ;;  %v1462_v59 = vpop.eup %1461 }
 0x177   : > { %1477 = vrsqrt.f32 %v808_v50  ;;  %v1464_v63 = vpop.eup %1463 }
 0x178   : > { %v843_v26 = vmul.f32 %v1456_v51, %v819_v13  ;;  %v770_v29 = vpop.xlane.xlu1 %769  ;;  %1479 = vrsqrt.f32 %v832_v52  ;;  %v1466_v1 = vpop.eup %1465 }
 0x179   : > { %v787_v57 = vpop.xlane.xlu0 %786  ;;  %v834_v0 = vmax.f32 %v770_v29, 1e-24  ;;  %1481 = vrsqrt.f32 %v810_v54  ;;  %v1468_v3 = vpop.eup %1467 }
 0x17a   : > { %v1318_v60 = vclamps-f32 %v843_v26, 1.0  ;;  %v821_v30 = vmul.f32 %v1458_v53, %v787_v57 }
 0x17b   : > { %1483 = vrsqrt.f32 %v834_v0 }
 0x17c   : > { %v867_v34 = vadd.f32 1.0, %v1318_v60  ;;  %v845_v47 = vmul.f32 %v1460_v56, %v821_v30  ;;  %v784_v2 = vpop.xlane.xlu1 %783 }
 0x17d   : > { %v820_v4 = vmul.f32 %v1462_v59, %v784_v2  ;;  %v793_v5 = vpop.xlane.xlu0 %792  ;;  %v1470_v6 = vpop.eup %1469 }
 0x17e   : > { %v875_v7 = vmul.f32 0.5, %v867_v34  ;;  %v1320_v8 = vclamps-f32 %v845_v47, 1.0  ;;  %v823_v9 = vmul.f32 %v1464_v63, %v793_v5  ;;  %v1472_v38 = vpop.eup %1471 }
 0x17f   : > { %v844_v10 = vmul.f32 %v1468_v3, %v820_v4  ;;  %v1474_v11 = vpop.eup %1473 }
 0x180   : > { %1485 = vlog2.f32 %v875_v7  ;;  %v908_v39 = vsub.f32 1.0, %v875_v7  ;;  %v869_v12 = vadd.f32 1.0, %v1320_v8  ;;  %v790_v18 = vpop.xlane.xlu1 %789  ;;  %v1476_v19 = vpop.eup %1475  ;;  %v847_v43 = vmul.f32 %v1470_v6, %v823_v9 }
 0x181   : > { %v1319_v55 = vclamps-f32 %v844_v10, 1.0  ;;  %v822_v23 = vmul.f32 %v1466_v1, %v790_v18  ;;  %v799_v28 = vpop.xlane.xlu0 %798  ;;  %v1478_v31 = vpop.eup %1477  ;;  %v1059_v17 = vrot.slane %v875_v7, %v2139_v61 }
 0x182   : > { %1487 = vlog2.f32 %v908_v39  ;;  %v877_v32 = vmul.f32 0.5, %v869_v12  ;;  %v825_v33 = vmul.f32 %v1472_v38, %v799_v28  ;;  %v1322_v35 = vclamps-f32 %v847_v43, 1.0  ;;  %v1480_v24 = vpop.eup %1479 }
 0x183   : > { %v868_v48 = vadd.f32 1.0, %v1319_v55  ;;  %v846_v14 = vmul.f32 %v1474_v11, %v822_v23  ;;  %v1482_v25 = vpop.eup %1481 }
 0x184   : > { %1489 = vlog2.f32 %v877_v32  ;;  %v910_v58 = vsub.f32 1.0, %v877_v32  ;;  %v796_v36 = vpop.xlane.xlu1 %795  ;;  %v849_v37 = vmul.f32 %v1476_v19, %v825_v33  ;;  %v871_v62 = vadd.f32 1.0, %v1322_v35 }
 0x185   : > { %v876_v15 = vmul.f32 0.5, %v868_v48  ;;  %v1321_v40 = vclamps-f32 %v846_v14, 1.0  ;;  %v824_v41 = vmul.f32 %v1478_v31, %v796_v36  ;;  %v1484_v50 = vpop.eup %1483  ;;  %v1067_v52 = vrot.slane %v877_v32, %v2139_v61 }
 0x186   : > { %1491 = vlog2.f32 %v910_v58  ;;  %v1324_v42 = vclamps-f32 %v849_v37, 1.0  ;;  %v879_v16 = vmul.f32 0.5, %v871_v62 }
 0x187   : > { %1493 = vlog2.f32 %v876_v15  ;;  %v909_v20 = vsub.f32 1.0, %v876_v15  ;;  %v1063_v44 = vrot.slane %v876_v15, %v2139_v61  ;;  %v870_v45 = vadd.f32 1.0, %v1321_v40 }
 0x188   : > { %v848_v27 = vmul.f32 %v1480_v24, %v824_v41  ;;  %v873_v46 = vadd.f32 1.0, %v1324_v42  ;;  %v802_v49 = vpop.xlane.xlu1 %801  ;;  %v912_v53 = vsub.f32 1.0, %v879_v16  ;;  %v1075_v34 = vrot.slane %v879_v16, %v2139_v61 }
 0x189   : > { %1495 = vlog2.f32 %v909_v20  ;;  %v1088_v22 = vsel %vm643_vm2, %v1063_v44, %v1059_v17  ;;  %v878_v51 = vmul.f32 0.5, %v870_v45  ;;  %v826_v21 = vmul.f32 %v1482_v25, %v802_v49 }
 0x18a   : > { %v1486_v13 = vpop.eup %1485  ;;  %1497 = vlog2.f32 %v879_v16  ;;  %v1323_v54 = vclamps-f32 %v848_v27, 1.0  ;;  %v881_v60 = vmul.f32 0.5, %v873_v46  ;;  %v1089_v0 = vsel %vm645_vm3, %v1067_v52, %v1088_v22 }
 0x18b   : > { %v885_v26 = vmul.f32 0.6931472, %v1486_v13  ;;  %1499 = vlog2.f32 %v878_v51  ;;  %v911_v29 = vsub.f32 1.0, %v878_v51  ;;  %v1071_v56 = vrot.slane %v878_v51, %v2139_v61 }
 0x18c   : > { %v1488_v57 = vpop.eup %1487  ;;  %1501 = vlog2.f32 %v912_v53  ;;  %v872_v59 = vadd.f32 1.0, %v1323_v54  ;;  %v850_v30 = vmul.f32 %v1484_v50, %v826_v21  ;;  %v914_v2 = vsub.f32 1.0, %v881_v60 }
 0x18d   : > { %v917_v63 = vmul.f32 0.6931472, %v1488_v57  ;;  %1503 = vlog2.f32 %v911_v29  ;;  %v900_v3 = vmax.f32 %v885_v26, -100.0  ;;  %v1083_v5 = vrot.slane %v881_v60, %v2139_v61 }
 0x18e   : > { %v1490_v1 = vpop.eup %1489  ;;  %v880_v47 = vmul.f32 0.5, %v872_v59  ;;  %1505 = vlog2.f32 %v881_v60  ;;  %v1325_v6 = vclamps-f32 %v850_v30, 1.0  ;;  %v1090_v38 = vsel %vm647_vm4, %v1071_v56, %v1089_v0 }
 0x18f   : > { %v889_v4 = vmul.f32 0.6931472, %v1490_v1  ;;  %v932_v11 = vmax.f32 %v917_v63, -100.0  ;;  %v1091_v55 = vsel %vm649_vm5, %v1075_v34, %v1090_v38  ;;  %v951_v43 = vrot.slane %v900_v3, %v2139_v61 }
 0x190   : > { %v1492_v7 = vpop.eup %1491  ;;  %1507 = vlog2.f32 %v880_v47  ;;  %v913_v8 = vsub.f32 1.0, %v880_v47  ;;  %v1079_v9 = vrot.slane %v880_v47, %v2139_v61  ;;  %v874_v19 = vadd.f32 1.0, %v1325_v6 }
 0x191   : > { %v1494_v10 = vpop.eup %1493  ;;  %v902_v39 = vmax.f32 %v889_v4, -100.0  ;;  %v921_v12 = vmul.f32 0.6931472, %v1492_v7  ;;  %1509 = vlog2.f32 %v914_v2  ;;  %v1001_v36 = vrot.slane %v932_v11, %v2139_v61 }
 0x192   : > { %v887_v18 = vmul.f32 0.6931472, %v1494_v10  ;;  %1511 = vlog2.f32 %v913_v8  ;;  %v1092_v31 = vsel %vm651_vm6, %v1079_v9, %v1091_v55  ;;  %v882_v14 = vmul.f32 0.5, %v874_v19 }
 0x193   : > { %v1496_v23 = vpop.eup %1495  ;;  %v934_v28 = vmax.f32 %v921_v12, -100.0  ;;  %v1093_v35 = vsel %vm653_vm7, %v1083_v5, %v1092_v31  ;;  %v959_v37 = vrot.slane %v902_v39, %v2139_v61 }
 0x194   : > { %v1498_v32 = vpop.eup %1497  ;;  %v901_v33 = vmax.f32 %v887_v18, -100.0  ;;  %v919_v48 = vmul.f32 0.6931472, %v1496_v23  ;;  %1513 = vlog2.f32 %v882_v14  ;;  %v915_v44 = vsub.f32 1.0, %v882_v14 }
 0x195   : > { %v1500_v58 = vpop.eup %1499  ;;  %v1009_v24 = vrot.slane %v934_v28, %v2139_v61  ;;  %v893_v15 = vmul.f32 0.6931472, %v1498_v32  ;;  %v1087_v45 = vrot.slane %v882_v14, %v2139_v61 }
 0x196   : > { %v1502_v40 = vpop.eup %1501  ;;  %v933_v62 = vmax.f32 %v919_v48, -100.0  ;;  %v955_v41 = vrot.slane %v901_v33, %v2139_v61  ;;  %v891_v25 = vmul.f32 0.6931472, %v1500_v58  ;;  %1515 = vlog2.f32 %v915_v44 }
 0x197   : > { %v1504_v17 = vpop.eup %1503  ;;  %v904_v42 = vmax.f32 %v893_v15, -100.0  ;;  %v925_v20 = vmul.f32 0.6931472, %v1502_v40  ;;  %v1094_v60 = vsel %vm655_vm8, %v1087_v45, %v1093_v35 }
 0x198   : > { %v1506_v16 = vpop.eup %1505  ;;  %v980_v27 = vsel %vm643_vm2, %v955_v41, %v951_v43  ;;  %v1005_v46 = vrot.slane %v933_v62, %v2139_v61  ;;  %v903_v49 = vmax.f32 %v891_v25, -100.0  ;;  %v923_v50 = vmul.f32 0.6931472, %v1504_v17 }
 0x199   : > { %v936_v22 = vmax.f32 %v925_v20, -100.0  ;;  %v967_v51 = vrot.slane %v904_v42, %v2139_v61  ;;  %v897_v21 = vmul.f32 0.6931472, %v1506_v16  ;;  %v981_v26 = vsel %vm645_vm3, %v959_v37, %v980_v27 }
 0x19a   : > { %v1508_v13 = vpop.eup %1507  ;;  %v1030_v52 = vsel %vm643_vm2, %v1005_v46, %v1001_v36  ;;  %v935_v53 = vmax.f32 %v923_v50, -100.0  ;;  %v963_v54 = vrot.slane %v903_v49, %v2139_v61 }
 0x19b   : > { %v1510_v29 = vpop.eup %1509  ;;  %v1017_v56 = vrot.slane %v936_v22, %v2139_v61  ;;  %v895_v57 = vmul.f32 0.6931472, %v1508_v13  ;;  %v906_v59 = vmax.f32 %v897_v21, -100.0  ;;  %v1031_v34 = vsel %vm645_vm3, %v1009_v24, %v1030_v52  ;;  %v1047_v22 = vld [vmem:[%s406_s12] sm:$0xff] }
 0x19c   : > { %v1512_v30 = vpop.eup %1511  ;;  %v1013_v63 = vrot.slane %v935_v53, %v2139_v61  ;;  %v929_v0 = vmul.f32 0.6931472, %v1510_v29  ;;  %v982_v1 = vsel %vm647_vm4, %v963_v54, %v981_v26 }
 0x19d   : > { %v905_v47 = vmax.f32 %v895_v57, -100.0  ;;  %v927_v2 = vmul.f32 0.6931472, %v1512_v30  ;;  %v983_v3 = vsel %vm649_vm5, %v967_v51, %v982_v1  ;;  %v975_v5 = vrot.slane %v906_v59, %v2139_v61 }
 0x19e   : > { %v938_v4 = vmax.f32 %v929_v0, -100.0  ;;  %v1032_v6 = vsel %vm647_vm4, %v1013_v63, %v1031_v34  ;;  %v1514_v38 = vpop.eup %1513  ;;  %v1114_v51 = vsub.f32 1.0, %v1047_v22 }
 0x19f   : > { %v937_v7 = vmax.f32 %v927_v2, -100.0  ;;  %v971_v8 = vrot.slane %v905_v47, %v2139_v61  ;;  %v1033_v9 = vsel %vm649_vm5, %v1017_v56, %v1032_v6  ;;  %v899_v39 = vmul.f32 0.6931472, %v1514_v38 }
 0x1a0   : > { %v1025_v10 = vrot.slane %v938_v4, %v2139_v61  ;;  %v1516_v19 = vpop.eup %1515 }
 0x1a1   : > { %v1021_v11 = vrot.slane %v937_v7, %v2139_v61  ;;  %v984_v12 = vsel %vm651_vm6, %v971_v8, %v983_v3  ;;  %v907_v55 = vmax.f32 %v899_v39, -100.0  ;;  %v931_v43 = vmul.f32 0.6931472, %v1516_v19 }
 0x1a2   : > { %v985_v18 = vsel %vm653_vm7, %v975_v5, %v984_v12 }
 0x1a3   : > { %v1034_v23 = vsel %vm651_vm6, %v1021_v11, %v1033_v9  ;;  %v979_v31 = vrot.slane %v907_v55, %v2139_v61  ;;  %v939_v32 = vmax.f32 %v931_v43, -100.0 }
 0x1a4   : > { %v1035_v28 = vsel %vm653_vm7, %v1025_v10, %v1034_v23 }
 0x1a5   : > { %v986_v33 = vsel %vm655_vm8, %v979_v31, %v985_v18  ;;  %v1029_v48 = vrot.slane %v939_v32, %v2139_v61 }
 0x1a7   : > { %v1036_v14 = vsel %vm655_vm8, %v1029_v48, %v1035_v28 }
 0x1ee   : > { %v674_v35 = vpop.trf.xlu0 }
 0x1ef   : > { %v883_v58 = vsub.f32 1.0, %v674_v35 }
 0x1f1   : > { %v989_v36 = vsub.f32 1.0, %v883_v58  ;;  %v1096_v37 = vsub.f32 %v883_v58, %v1094_v60  ;;  %v988_v24 = vmul.f32 %v986_v33, %v883_v58 }
 0x1f3   : > { %v1097_v15 = vmul.f32 %v1096_v37, %v1096_v37  ;;  %v1038_v40 = vmul.f32 %v1036_v14, %v989_v36 }
 0x1f5   : > { %v1098_v62 = vsel %vm1041_vm9, %v1097_v15, 0.0  ;;  %v1039_v41 = vadd.f32 %v1038_v40, %v988_v24 }
 0x1f6   : > { %1099 = vadd.xlane.f32.xlu1 %v1098_v62 }
 0x1f7   : > { %v1040_v25 = vsub.f32 0.0, %v1039_v41 }
 0x1f9   : > { %v1042_v17 = vsel %vm1041_vm9, %v1040_v25, 0.0 }
 0x1fa   : > { %1043 = vadd.xlane.f32.xlu1 %v1042_v17 }
 0x283   : > { %v1100_v61 = vpop.xlane.xlu1 %1099 }
 0x284   : > { %1517 = vrsqrt.f32 %v1100_v61  ;;  %vm1103_vm11 = vcmp.eq.f32.partialorder %v1100_v61, inf  ;;  %v1106_v45 = vand.u32 2147483648, %v1100_v61  ;;  %vm1105_vm12 = vcmp.eq.f32.partialorder %v1100_v61, 0.0 }
 0x287   : > { %v1044_v42 = vpop.xlane.xlu1 %1043 }
 0x288   : > { %1046 = vst.msk [vmem:[%s410_s24] sm:$0xff] %vm1045_vm10, %v1044_v42 }
 0x28e   : > { %v1518_v20 = vpop.eup %1517 }
 0x28f   : > { %v1102_v44 = vmul.f32 %v1518_v20, %v1100_v61 }
 0x291   : > { %v1104_v16 = vsel %vm1103_vm11, %v1100_v61, %v1102_v44 }
 0x292   : > { %v1107_v27 = vsel %vm1105_vm12, %v1106_v45, %v1104_v16 }
 0x293   : > { %v1326_v46 = vmul.f32 -1.442695, %v1107_v27 }
 0x295   : > { %1519 = vpow2.f32 %v1326_v46 }
 0x29f   : > { %v1520_v49 = vpop.eup %1519 }
 0x2a0   : > { %v1111_v50 = vadd.f32 1.0, %v1520_v49 }
 0x2a2   : > { %1521 = vrcp.f32 %v1111_v50 }
 0x2ac   : > { %v1522_v21 = vpop.eup %1521 }
 0x2ad   : > { %v1117_v13 = vsub.f32 1.0, %v1522_v21  ;;  %v1115_v52 = vmul.f32 %v1522_v21, %v1114_v51 }
 0x2af   : > { %v1118_v53 = vmax.f32 %v1117_v13, 0.0  ;;  %v1116_v26 = vmul.f32 %v1522_v21, %v1115_v52 }
 0x2b1   : > { %v1119_v54 = vmul.f32 %v1118_v53, %v1118_v53 }
 0x2b3   : > { %v1120_v29 = vmul.f32 %v1119_v54, %v1047_v22 }
 0x2b5   : > { %v1121_v56 = vadd.f32 %v1120_v29, %v1116_v26 }
 0x2b7   : > { %1122 = vst.msk [vmem:[%s414_s20] sm:$0xff] %vm1045_vm10, %v1121_v56 }
 0x2b8 PF: > { %p23_p3 = scmp.ge.s32.totalorder %s1751_s26, 4   ;;  %s2261_s21 = smov %s1677_s22 }
 0x2b9   : > { %s2262_s22 = smov %s1681_s23  ;;  %s2263_s23 = smov %s1761_s29 }
 0x2ba   : > { %s2264_s24 = smov %s1751_s26  ;;  %25 = sbr.rel (!%p23_p3) target bundleno = 10 (0xa), region = 132 }
 0x2c1   :  { %1156 = vsyncpa [#allocation3], 1 }
 0x2c2   :  { %1158 = vsyncpa [#allocation3 + $0x1], 1 }
 0x2c3   :  { %1159 = vsyncpa [#allocation5], 1 }
 0x2c4   :  { %1161 = vsyncpa [#allocation5 + $0x1], 1 }
 0x2c5   :  { %1162 = vsyncpa [#allocation8], 1 }
 0x2c6   :  { %1164 = vsyncpa [#allocation8 + $0x1], 1 }

</bundles_post_ra>
